<compile_context>
chip_gen: v5e
topology: v5e:2x2
jax: 0.10.0
libtpu: 0.0.40
codegen_flags: <defaults>
</compile_context>

<pallas_src>
import functools

import jax
import jax.numpy as jnp
from jax.experimental import pallas as pl
from jax.experimental.pallas import tpu as pltpu

_EPS = 1e-5
_LANE = 128


def _ceil_to(a, m):
    return -(-a // m) * m


def _ln_math(x_raw, w, b, h_true, h_padded, out_dtype):
    x = x_raw.astype(jnp.float32)
    if h_padded != h_true:
        lane = jax.lax.broadcasted_iota(jnp.int32, x.shape, x.ndim - 1)
        keep = lane < h_true
        xs = jnp.where(keep, x, 0.0)
    else:
        keep = None
        xs = x
    inv_h = jnp.float32(1.0 / h_true)
    mean = jnp.sum(xs, axis=-1, keepdims=True) * inv_h
    xc = x - mean
    xcs = jnp.where(keep, xc, 0.0) if keep is not None else xc
    var = jnp.sum(xcs * xcs, axis=-1, keepdims=True) * inv_h  # biased variance, matches F.layer_norm
    y = xc * jax.lax.rsqrt(var + _EPS)
    y = y * w.astype(jnp.float32)
    if b is not None:
        y = y + b.astype(jnp.float32)
    return y.astype(out_dtype)


def _layernorm_kernel_bias(x_ref, w_ref, b_ref, o_ref, *, h_true, h_padded):
    o_ref[...] = _ln_math(x_ref[...], w_ref[...], b_ref[...], h_true, h_padded, o_ref.dtype)


def _layernorm_kernel_nobias(x_ref, w_ref, o_ref, *, h_true, h_padded):
    # bias=None variant: one fewer DMA stream / VMEM buffer and no per-step add.
    o_ref[...] = _ln_math(x_ref[...], w_ref[...], None, h_true, h_padded, o_ref.dtype)


def _tpu_info():
    """Returns (per-TensorCore VMEM bytes, #TensorCores sharing the 'parallel' grid axis)."""
    vmem_cap = 64 << 20  # conservative fallback (v7x per-TC VMEM)
    is_v7x = False
    try:
        info = pltpu.get_tpu_info()
        vmem_cap = int(info.vmem_capacity_bytes)
        ver = getattr(info, "chip_version", None)
        if ver is not None and "7" in str(ver):
            is_v7x = True
    except Exception:
        pass
    try:
        kind = jax.devices()[0].device_kind.lower()
        if "v7" in kind or "7x" in kind:
            is_v7x = True
    except Exception:
        pass
    if is_v7x:
        # v7x VMEM is 64 MiB *per TensorCore*; normalize in case the query
        # reports chip-level capacity.
        vmem_cap = min(vmem_cap, 64 << 20)
    return vmem_cap, (2 if is_v7x else 1)


def _pick_block_rows(rows, h_padded, x_itemsize, vmem_cap, num_tc):
    # Sublane pack keeps vregs full / stores unmasked: 8 f32, 16 bf16, 32 int8/fp8.
    pack = max(8, 32 // max(x_itemsize, 1))

    # Live VMEM per tile row: double-buffered input + output tiles in x dtype
    # PLUS ~2 full f32 copies of the tile from the in-kernel up-cast.
    per_row_bytes = 4 * h_padded * x_itemsize + 2 * h_padded * 4

    # Whole live working set <= ~1/3 of per-TC VMEM; the input tile itself is
    # capped bytes-wise (~4 MiB, HBM-roofline sweet spot), not at a row count.
    budget = min(vmem_cap // 3, 16 << 20)
    br = budget // max(per_row_bytes, 1)
    br = min(br, (4 << 20) // max(h_padded * x_itemsize, 1))
    br = max(pack, (br // pack) * pack)

    rows_padded = _ceil_to(rows, pack)
    br = min(br, rows_padded)
    br = max(pack, (br // pack) * pack)

    # Megacore load balance (v7x only; single-TC v5e/v6e gains nothing from
    # splitting an input that already fits one tile): aim for an even multiple
    # of num_tc near-equal grid steps (>= 2*num_tc).
    if num_tc > 1 and rows_padded > num_tc * pack:
        steps = -(-rows_padded // br)
        target = max(2 * num_tc, _ceil_to(steps, num_tc))
        br_bal = _ceil_to(-(-rows_padded // target), pack)
        br = max(pack, min(br, br_bal))
    return br


def layer_norm(x, weight, bias=None, *, block_rows=None):
    """LayerNorm over the last dim of x, eps=1e-5, matching torch.nn.functional.layer_norm."""
    orig_shape = x.shape
    H = int(orig_shape[-1])
    rows = 1
    for d in orig_shape[:-1]:
        rows *= int(d)

    Hp = _ceil_to(H, _LANE)  # lane-dense padded hidden size
    x2 = x.reshape(rows, H)
    w2 = weight.reshape(1, H)
    b2 = None if bias is None else bias.reshape(1, H)
    if Hp != H:
        x2 = jnp.pad(x2, ((0, 0), (0, Hp - H)))
        w2 = jnp.pad(w2, ((0, 0), (0, Hp - H)))
        if b2 is not None:
            b2 = jnp.pad(b2, ((0, 0), (0, Hp - H)))

    x_itemsize = jnp.dtype(x.dtype).itemsize
    vmem_cap, num_tc = _tpu_info()
    if block_rows is None:
        block_rows = _pick_block_rows(rows, Hp, x_itemsize, vmem_cap, num_tc)

    # Ragged last row-tile is safe: rows are independent and Pallas masks the
    # out-of-bounds rows of the final block on write-back.
    grid = (pl.cdiv(rows, block_rows),)

    # Scoped-VMEM limit: f32 up-cast working set + double-buffered x-dtype tiles
    # + params + internal scratch, clamped to per-TC capacity minus headroom
    # (tight, so surrounding XLA fusions keep their VMEM).
    per_row_bytes = 4 * Hp * x_itemsize + 2 * Hp * 4
    param_bytes = (4 if bias is not None else 2) * Hp * 4
    needed = block_rows * per_row_bytes + param_bytes + (2 << 20)
    vmem_limit = int(min(vmem_cap - (4 << 20), max(needed + (6 << 20), 16 << 20)))

    compiler_params = pltpu.CompilerParams(
        dimension_semantics=("parallel",),
        vmem_limit_bytes=vmem_limit,
    )

    x_spec = pl.BlockSpec((block_rows, Hp), lambda i: (i, 0))
    p_spec = pl.BlockSpec((1, Hp), lambda i: (0, 0))
    o_spec = pl.BlockSpec((block_rows, Hp), lambda i: (i, 0))

    if bias is None:
        kernel = functools.partial(_layernorm_kernel_nobias, h_true=H, h_padded=Hp)
        in_specs = [x_spec, p_spec]
        args = (x2, w2)
    else:
        kernel = functools.partial(_layernorm_kernel_bias, h_true=H, h_padded=Hp)
        in_specs = [x_spec, p_spec, p_spec]
        args = (x2, w2, b2)

    out = pl.pallas_call(
        kernel,
        out_shape=jax.ShapeDtypeStruct((rows, Hp), x.dtype),
        grid_spec=pltpu.PrefetchScalarGridSpec(
            num_scalar_prefetch=0,
            grid=grid,
            in_specs=in_specs,
            out_specs=o_spec,
        ),
        compiler_params=compiler_params,
    )(*args)

    if Hp != H:
        out = out[:, :H]
    return out.reshape(orig_shape)


def _ref_layer_norm(x, weight, bias):
    xf = x.astype(jnp.float32)
    mean = jnp.mean(xf, axis=-1, keepdims=True)
    var = jnp.mean((xf - mean) ** 2, axis=-1, keepdims=True)
    y = (xf - mean) * jax.lax.rsqrt(var + _EPS) * weight.astype(jnp.float32)
    if bias is not None:
        y = y + bias.astype(jnp.float32)
    return y.astype(x.dtype)


if __name__ == "__main__":
    key = jax.random.PRNGKey(0)
    k1, k2, k3, k4 = jax.random.split(key, 4)

    # Typical usage of the module: (batch, seq, hidden) with hidden % 128 == 0.
    batch, seq, hidden = 2, 8, 128
    weight = jnp.ones((hidden,), dtype=jnp.float32)   # nn.Parameter(torch.ones(ndim))
    bias = jnp.zeros((hidden,), dtype=jnp.float32)    # nn.Parameter(torch.zeros(ndim))
    x = jax.random.normal(k1, (batch, seq, hidden), dtype=jnp.float32)

    y = layer_norm(x, weight, bias)
    jax.block_until_ready(y)
    assert jnp.allclose(y, _ref_layer_norm(x, weight, bias), atol=1e-4, rtol=1e-4), \
        "mismatch vs reference (bias)"

    y_nb = layer_norm(x, weight, None)                # bias=False case
    jax.block_until_ready(y_nb)
    assert jnp.allclose(y_nb, _ref_layer_norm(x, weight, None), atol=1e-4, rtol=1e-4), \
        "mismatch vs reference (no bias)"

    # Non-multiple-of-128 hidden size exercises the lane-padding + masked-reduction path.
    h2 = 48
    w_small = jax.random.normal(k2, (h2,), dtype=jnp.float32)
    b_small = jax.random.normal(k3, (h2,), dtype=jnp.float32)
    x_small = jax.random.normal(k4, (batch, seq, h2), dtype=jnp.float32)
    y_small = layer_norm(x_small, w_small, b_small)
    jax.block_until_ready(y_small)
    assert jnp.allclose(y_small, _ref_layer_norm(x_small, w_small, b_small),
                        atol=1e-4, rtol=1e-4), "mismatch vs reference (padded H)"

    print("KERNEL_OK")
</pallas_src>

<mosaic_0001>
module attributes {stable_mosaic.version = 11 : i64} {
  func.func @_layernorm_kernel_bias(%arg0: i32, %arg1: memref<16x128xf32, #tpu.memory_space<vmem>>, %arg2: memref<1x128xf32, #tpu.memory_space<vmem>>, %arg3: memref<1x128xf32, #tpu.memory_space<vmem>>, %arg4: memref<16x128xf32, #tpu.memory_space<vmem>>) attributes {dimension_semantics = [#tpu.dimension_semantics<parallel>], iteration_bounds = array<i64: 1>, scalar_prefetch = 0 : i64, scratch_operands = 0 : i64, tpu.core_type = #tpu.core_type<tc>, window_params = [{transform_indices = @transform_0, window_bounds = array<i64: 16, 128>}, {pipeline_mode = #tpu.pipeline_mode<synchronous>, transform_indices = @transform_1, window_bounds = array<i64: 1, 128>}, {pipeline_mode = #tpu.pipeline_mode<synchronous>, transform_indices = @transform_2, window_bounds = array<i64: 1, 128>}, {transform_indices = @transform_3, window_bounds = array<i64: 16, 128>}]} {
    %c0 = arith.constant 0 : index
    %c0_0 = arith.constant 0 : index
    %0 = vector.load %arg1[%c0, %c0_0] : memref<16x128xf32, #tpu.memory_space<vmem>>, vector<16x128xf32>
    %c0_1 = arith.constant 0 : index
    %c0_2 = arith.constant 0 : index
    %1 = vector.load %arg2[%c0_1, %c0_2] : memref<1x128xf32, #tpu.memory_space<vmem>>, vector<1x128xf32>
    %c0_3 = arith.constant 0 : index
    %c0_4 = arith.constant 0 : index
    %2 = vector.load %arg3[%c0_3, %c0_4] : memref<1x128xf32, #tpu.memory_space<vmem>>, vector<1x128xf32>
    %cst = arith.constant dense<0.000000e+00> : vector<16xf32>
    %3 = vector.multi_reduction <add>, %0, %cst [1] : vector<16x128xf32> to vector<16xf32>
    %4 = vector.shape_cast %3 : vector<16xf32> to vector<16x1xf32>
    %cst_5 = arith.constant 7.812500e-03 : f32
    %5 = vector.broadcast %cst_5 : f32 to vector<16x1xf32>
    %6 = arith.mulf %4, %5 : vector<16x1xf32>
    %7 = vector.broadcast %6 : vector<16x1xf32> to vector<16x128xf32>
    %8 = arith.subf %0, %7 : vector<16x128xf32>
    %9 = arith.mulf %8, %8 : vector<16x128xf32>
    %cst_6 = arith.constant dense<0.000000e+00> : vector<16xf32>
    %10 = vector.multi_reduction <add>, %9, %cst_6 [1] : vector<16x128xf32> to vector<16xf32>
    %11 = vector.shape_cast %10 : vector<16xf32> to vector<16x1xf32>
    %cst_7 = arith.constant 7.812500e-03 : f32
    %12 = vector.broadcast %cst_7 : f32 to vector<16x1xf32>
    %13 = arith.mulf %11, %12 : vector<16x1xf32>
    %cst_8 = arith.constant 9.99999974E-6 : f32
    %14 = vector.broadcast %cst_8 : f32 to vector<16x1xf32>
    %15 = arith.addf %13, %14 : vector<16x1xf32>
    %16 = math.rsqrt %15 : vector<16x1xf32>
    %17 = vector.broadcast %16 : vector<16x1xf32> to vector<16x128xf32>
    %18 = arith.mulf %8, %17 : vector<16x128xf32>
    %19 = vector.broadcast %1 : vector<1x128xf32> to vector<16x128xf32>
    %20 = arith.mulf %18, %19 : vector<16x128xf32>
    %21 = vector.broadcast %2 : vector<1x128xf32> to vector<16x128xf32>
    %22 = arith.addf %20, %21 : vector<16x128xf32>
    %c0_9 = arith.constant 0 : index
    %c0_10 = arith.constant 0 : index
    %23 = vector.load %arg4[%c0_9, %c0_10] : memref<16x128xf32, #tpu.memory_space<vmem>>, vector<16x128xf32>
    tpu.vector_store %arg4[%c0_9, %c0_10], %22 {strides = array<i32>} : memref<16x128xf32, #tpu.memory_space<vmem>>, vector<16x128xf32>,
    return
  }
  func.func @transform_0(%arg0: i32) -> (i32, i32) {
    %c0_i32 = arith.constant 0 : i32
    %c0_i32_0 = arith.constant 0 : i32
    return %arg0, %c0_i32 : i32, i32
  }
  func.func @transform_1(%arg0: i32) -> (i32, i32) {
    %c0_i32 = arith.constant 0 : i32
    %c0_i32_0 = arith.constant 0 : i32
    %c0_i32_1 = arith.constant 0 : i32
    return %c0_i32, %c0_i32_0 : i32, i32
  }
  func.func @transform_2(%arg0: i32) -> (i32, i32) {
    %c0_i32 = arith.constant 0 : i32
    %c0_i32_0 = arith.constant 0 : i32
    %c0_i32_1 = arith.constant 0 : i32
    return %c0_i32, %c0_i32_0 : i32, i32
  }
  func.func @transform_3(%arg0: i32) -> (i32, i32) {
    %c0_i32 = arith.constant 0 : i32
    %c0_i32_0 = arith.constant 0 : i32
    return %arg0, %c0_i32 : i32, i32
  }
}

</mosaic_0001>

<bundles_post_ra>
// kernel: tpu_custom_call.1
= control target key start
LH: loop header
LB: loop body
LE: loop exit
PB: predicated region body
PF: predicated region fallthrough
CT: control target
= control target key end

     0   :  { %8 = vsyncpa [#allocation3], 0  ;;  %s253_s0 = inlined_call_operand.hbm [shape: f32[16,128], index: 0, kind: input, shape index: {}]   ;;  %s254_s1 = inlined_call_operand.hbm [shape: f32[1,128], index: 1, kind: input, shape index: {}]   ;;  %s255_s2 = inlined_call_operand.vmem [shape: f32[1,128], index: 2, kind: input, shape index: {}]   ;;  %s256_s3 = inlined_call_operand.hbm [shape: f32[16,128], index: 3, kind: output, shape index: {}]  }
   0x1   :  { %9 = vsyncpa [#allocation6], 0 }
   0x2   :  { %10 = vsyncpa [#allocation4], 0  ;;  %s15_s14 = sshll.u32 %s253_s0, 4  ;;  %s210_s15 = smov [#allocation2]   ;;  %s16_s14 = int_to_ptr.hbm [resolvable:$true] %s15_s14 }
   0x3   :  { %s17_s16 = sshll.u32 %s210_s15, 4  ;;  %s29_s19 = sshll.u32 %s254_s1, 4  ;;  %s18_s16 = int_to_ptr.vmem [resolvable:$true] %s17_s16  ;;  %s30_s19 = int_to_ptr.hbm [resolvable:$true] %s29_s19 }
   0x4   :  { %s211_s20 = smov 128   ;;  %s212_s21 = smov 8  }
   0x5   :  { %23 = dma.hbm_to_vmem [thread:$0]  %s16_s14, 256, %s18_s16, [#allocation3], %s211_s20, %s211_s20, %s212_s21  }
   0x6   :  { %s213_s22 = smov [#allocation5]  }
   0x7   :  { %s31_s23 = sshll.u32 %s213_s22, 4  ;;  %s32_s23 = int_to_ptr.vmem [resolvable:$true] %s31_s23 }
   0x8   :  { %34 = dma.hbm_to_vmem [thread:$0]  %s30_s19, 16, %s32_s23, [#allocation6]  }
   0x9   :  { %204 = dma.done.wait [#allocation3], 256  }
   0xa   :  { %205 = vsyncadd [#allocation3], 4294967040 }
   0xb   :  { %206 = dma.done.wait [#allocation6], 16  }
   0xc   :  { %207 = vsyncadd [#allocation6], 4294967280  ;;  %v45_v0 = vld [vmem:[#allocation2] sm:$0xff]  ;;  %v46_v1 = vld [vmem:[#allocation2 + $0x8] sm:$0xff]  ;;  %s214_s24 = smov [#allocation7]   ;;  %s107_s28 = sshll.u32 %s256_s3, 4  ;;  %s108_s28 = int_to_ptr.hbm [resolvable:$true] %s107_s28 }
   0xd   :  { %49 = vadd.xlane.f32.xlu0 %v45_v0  ;;  %v126_v24 = vld [vmem:[#allocation5] ss:$0 sm:$0xff]  ;;  %v127_v28 = vld [vmem:[%s255_s2] ss:$0 sm:$0xff]  ;;  %s105_s25 = sshll.u32 %s214_s24, 4  ;;  %s106_s25 = int_to_ptr.vmem [resolvable:$true] %s105_s25 }
  0x15   :  { %51 = vadd.xlane.f32.xlu0 %v46_v1 }
  0x80   :  { %v50_v2 = vpop.xlane.xlu0 %49 }
  0x81   :  { %v53_v3 = vmul.f32 0.0078125, %v50_v2 }
  0x83   :  { %v55_v4 = vsub.f32 %v45_v0, %v53_v3 }
  0x85   :  { %v57_v5 = vmul.f32 %v55_v4, %v55_v4 }
  0x87   :  { %59 = vadd.xlane.f32.xlu1 %v57_v5 }
  0x88   :  { %v52_v6 = vpop.xlane.xlu0 %51 }
  0x89   :  { %v54_v7 = vmul.f32 0.0078125, %v52_v6 }
  0x8b   :  { %v56_v8 = vsub.f32 %v46_v1, %v54_v7 }
  0x8d   :  { %v58_v9 = vmul.f32 %v56_v8, %v56_v8 }
  0x8f   :  { %61 = vadd.xlane.f32.xlu1 %v58_v9 }
  0xfa   :  { %v60_v10 = vpop.xlane.xlu1 %59 }
  0xfb   :  { %v63_v11 = vmul.f32 0.0078125, %v60_v10 }
  0xfd   :  { %v65_v12 = vadd.f32 1e-05, %v63_v11 }
  0xff   :  { %128 = vrsqrt.f32 %v65_v12  ;;  %vm73_vm1 = vweird.f32 %v65_v12 }
 0x102   :  { %v62_v13 = vpop.xlane.xlu1 %61 }
 0x103   :  { %v64_v14 = vmul.f32 0.0078125, %v62_v13 }
 0x105   :  { %v129_v15 = vpop.eup %128  ;;  %v66_v16 = vadd.f32 1e-05, %v64_v14 }
 0x106   :  { %v68_v17 = vmul.f32 %v129_v15, %v65_v12  ;;  %vm74_vm0 = vweird.f32 %v129_v15 }
 0x107   :  { %130 = vrsqrt.f32 %v66_v16  ;;  %vm75_vm2 = vmor %vm73_vm1, %vm74_vm0  ;;  %vm83_vm4 = vweird.f32 %v66_v16 }
 0x108   :  { %v69_v18 = vmul.f32 %v129_v15, %v68_v17 }
 0x10a   :  { %v70_v19 = vmul.f32 0.5, %v69_v18 }
 0x10c   :  { %v71_v20 = vsub.f32 1.5, %v70_v19 }
 0x10d   :  { %v131_v21 = vpop.eup %130 }
 0x10e   :  { %v72_v22 = vmul.f32 %v129_v15, %v71_v20  ;;  %v78_v23 = vmul.f32 %v131_v21, %v66_v16  ;;  %vm84_vm3 = vweird.f32 %v131_v21 }
 0x10f   :  { %vm85_vm5 = vmor %vm83_vm4, %vm84_vm3 }
 0x110   :  { %v76_v25 = vsel %vm75_vm2, %v129_v15, %v72_v22  ;;  %v79_v26 = vmul.f32 %v131_v21, %v78_v23 }
 0x111   :  { %v87_v27 = vmul.f32 %v76_v25, %v55_v4 }
 0x112   :  { %v80_v29 = vmul.f32 0.5, %v79_v26 }
 0x113   :  { %v92_v30 = vmul.f32 %v126_v24, %v87_v27 }
 0x114   :  { %v81_v31 = vsub.f32 1.5, %v80_v29 }
 0x115   :  { %v97_v32 = vadd.f32 %v127_v28, %v92_v30 }
 0x116   :  { %v82_v33 = vmul.f32 %v131_v21, %v81_v31 }
 0x117   :  { %99 = vst [vmem:[#allocation7] sm:$0xff] %v97_v32 }
 0x118   :  { %v86_v34 = vsel %vm85_vm5, %v131_v21, %v82_v33 }
 0x119   :  { %v88_v35 = vmul.f32 %v86_v34, %v56_v8 }
 0x11b   :  { %v93_v36 = vmul.f32 %v126_v24, %v88_v35 }
 0x11d   :  { %v98_v37 = vadd.f32 %v127_v28, %v93_v36 }
 0x11f   :  { %100 = vst [vmem:[#allocation7 + $0x8] sm:$0xff] %v98_v37 }
 0x120   :  { %113 = dma.vmem_to_hbm [thread:$0]  %s106_s25, 256, %s108_s28, [#allocation4], %s211_s20, %s211_s20, %s212_s21  }
 0x121   :  { %208 = dma.done.wait [#allocation4], 256  }
 0x122   :  { %209 = vsyncadd [#allocation4], 4294967040 }
 0x123   :  { %118 = vsyncpa [#allocation3], 1 }
 0x124   :  { %119 = vsyncpa [#allocation6], 1 }
 0x125   :  { %120 = vsyncpa [#allocation4], 1 }

</bundles_post_ra>
